<compile_context>
chip_gen: v6e
topology: v6e:2x2x1
jax: 0.10.0
libtpu: 0.0.40
codegen_flags: <defaults>
</compile_context>

<pallas_src>
import jax
import jax.numpy as jnp
from jax.experimental import pallas as pl
from jax.experimental.pallas import tpu as pltpu


def _round_up(x, m):
    return (x + m - 1) // m * m


def fm_packed_kernel(free_ref, attrs_ref, w_ref, out_ref):
    """out_packed = free_packed + attrs_packed @ W_blockdiag.

    All refs are 128 lanes wide (fully dense vregs, unmasked stores).
    W_blockdiag places each original row's projection into lanes
    [d_free : d_free+d_union) of its 16-lane sub-block; free_packed already has
    the free embedding in lanes [0 : d_free) and zeros elsewhere, so a plain add
    realises the concat.
    """
    proj = jnp.dot(
        attrs_ref[...],
        w_ref[...],
        preferred_element_type=jnp.float32,
        precision=jax.lax.Precision.HIGHEST,
    )
    out_ref[...] = (free_ref[...] + proj).astype(out_ref.dtype)


def _choose_row_tile(n, row_align, max_row_tile, target_steps=4):
    """Row tile (in original rows): multiple of `row_align`, as large as possible
    (amortize per-step overhead) but giving >= `target_steps` grid steps so both
    v7x TensorCores stay busy."""
    max_row_tile = max(row_align, (max_row_tile // row_align) * row_align)
    n_aligned = _round_up(n, row_align)
    tile = min(max_row_tile, n_aligned)
    if n_aligned // tile < target_steps:
        tile = max(row_align, _round_up(pl.cdiv(n_aligned, target_steps), row_align))
    return tile


def fm_side_forward(free_emb, attrs_input, trans_w, *, max_row_tile=16384):
    """One side (user or item) of FM.forward: concat(free_emb, attrs_input @ trans_w)."""
    n, d_free = free_emb.shape
    n2, d_attr = attrs_input.shape
    d_attr2, d_union = trans_w.shape
    assert n == n2 and d_attr == d_attr2
    d_out = d_free + d_union

    # Sub-block width (lanes per original row) in the packed 128-lane layout.
    sb = 8
    while sb < max(d_out, d_attr):
        sb *= 2
    assert sb <= 128, "FM embedding/attr dims expected to be small (<=128)"
    rpp = 128 // sb              # original rows per packed (128-lane) row
    row_align = 8 * rpp          # keeps packed 2nd-minor block dim a multiple of 8

    tile = _choose_row_tile(n, row_align, max_row_tile)
    n_pad = _round_up(n, tile)   # every grid block is full -> all-dense DMAs/stores
    grid = (n_pad // tile,)
    rp = tile // rpp             # packed rows per block

    # --- Lane-dense packing at the pallas_call boundary -------------------------
    # The pads are one small XLA pass each (in production the embeddings/attrs
    # would simply be stored pre-padded); the reshapes are free row-major views.
    free_p = jnp.pad(free_emb, ((0, n_pad - n), (0, sb - d_free)))
    attrs_p = jnp.pad(attrs_input, ((0, n_pad - n), (0, sb - d_attr)))
    free_pk = free_p.reshape(n_pad // rpp, 128)
    attrs_pk = attrs_p.reshape(n_pad // rpp, 128)

    # Block-diagonal weight: for each of the `rpp` sub-blocks, map the sub-block's
    # d_attr input lanes onto its output lanes [d_free : d_free + d_union).
    wblk = jnp.zeros((sb, sb), trans_w.dtype)
    wblk = wblk.at[:d_attr, d_free:d_free + d_union].set(trans_w)
    wbig = jnp.kron(jnp.eye(rpp, dtype=trans_w.dtype), wblk)      # (128, 128)

    cost = pl.CostEstimate(
        flops=2 * (n_pad // rpp) * 128 * 128,
        transcendentals=0,
        bytes_accessed=4 * (3 * (n_pad // rpp) * 128 + 128 * 128),
    )

    out_pk = pl.pallas_call(
        fm_packed_kernel,
        out_shape=jax.ShapeDtypeStruct((n_pad // rpp, 128), free_emb.dtype),
        grid_spec=pltpu.PrefetchScalarGridSpec(
            num_scalar_prefetch=0,
            grid=grid,
            in_specs=[
                # Row-tiled packed operands: block index advances with the grid step.
                pl.BlockSpec((rp, 128), lambda i: (i, 0)),
                pl.BlockSpec((rp, 128), lambda i: (i, 0)),
                # Small block-diagonal weight stays resident across all row tiles.
                pl.BlockSpec((128, 128), lambda i: (0, 0)),
            ],
            out_specs=pl.BlockSpec((rp, 128), lambda i: (i, 0)),
        ),
        compiler_params=pltpu.CompilerParams(
            # Row tiles are independent -> shard across TensorCores on v7x.
            dimension_semantics=("parallel",),
            vmem_limit_bytes=48 * 1024 * 1024,
        ),
        cost_estimate=cost,
    )(free_pk, attrs_pk, wbig)

    # Unpack: free row-major reshape back to per-row layout, drop row/col padding.
    return out_pk.reshape(n_pad, sb)[:n, :d_out]


def fm_forward(params, user_attrs_input, item_attrs_input):
    """Equivalent of FM.forward(**kwargs) -> (final_user_emb, final_item_emb)."""
    final_user_emb = fm_side_forward(
        params["user_emb"], user_attrs_input, params["user_attrs_trans_w"]
    )
    final_item_emb = fm_side_forward(
        params["item_emb"], item_attrs_input, params["item_attrs_trans_w"]
    )
    return final_user_emb, final_item_emb


def init_params(key, user_count, item_count, free_emb_dim, attr_union_dim,
                user_attr_dim, item_attr_dim):
    """Deterministic synthetic init mirroring FM.init_net_data (std=0.01 normals)."""
    ks = jax.random.split(key, 4)
    return {
        "user_emb": 0.01 * jax.random.normal(ks[0], (user_count, free_emb_dim), jnp.float32),
        "item_emb": 0.01 * jax.random.normal(ks[1], (item_count, free_emb_dim), jnp.float32),
        "user_attrs_trans_w": 0.01 * jax.random.normal(ks[2], (user_attr_dim, attr_union_dim), jnp.float32),
        "item_attrs_trans_w": 0.01 * jax.random.normal(ks[3], (item_attr_dim, attr_union_dim), jnp.float32),
    }
    # TODO(synk): user/item_attrs_infer_w/_b (used only by *_attr_inference, not forward)
    # are omitted; forward() does not touch them.


if __name__ == "__main__":
    # Small synthetic config consistent with the module; row counts chosen so each
    # side exercises multiple row tiles (the tile chooser targets a 4-step grid).
    user_count, item_count = 1000, 700
    free_emb_dim, attr_union_dim = 8, 8
    user_attr_dim = 12   # sum(user_attr.attr_dim_list) e.g. [4, 8]
    item_attr_dim = 10   # sum(item_attr.attr_dim_list) e.g. [6, 4]

    key = jax.random.PRNGKey(0)
    pkey, ukey, ikey = jax.random.split(key, 3)

    params = init_params(pkey, user_count, item_count, free_emb_dim,
                         attr_union_dim, user_attr_dim, item_attr_dim)

    user_attrs_input = jax.random.normal(ukey, (user_count, user_attr_dim), jnp.float32)
    item_attrs_input = jax.random.normal(ikey, (item_count, item_attr_dim), jnp.float32)

    fm_forward_jit = jax.jit(fm_forward)
    final_user_emb, final_item_emb = fm_forward_jit(params, user_attrs_input, item_attrs_input)
    jax.block_until_ready((final_user_emb, final_item_emb))

    # Pure-JAX reference check of forward semantics (same HIGHEST dot precision as
    # the kernel so the comparison is f32-accurate on both sides).
    ref_user = jnp.concatenate(
        [params["user_emb"],
         jnp.dot(user_attrs_input, params["user_attrs_trans_w"],
                 precision=jax.lax.Precision.HIGHEST)], axis=1)
    ref_item = jnp.concatenate(
        [params["item_emb"],
         jnp.dot(item_attrs_input, params["item_attrs_trans_w"],
                 precision=jax.lax.Precision.HIGHEST)], axis=1)

    assert final_user_emb.shape == (user_count, free_emb_dim + attr_union_dim)
    assert final_item_emb.shape == (item_count, free_emb_dim + attr_union_dim)
    assert jnp.allclose(final_user_emb, ref_user, atol=1e-5, rtol=1e-5)
    assert jnp.allclose(final_item_emb, ref_item, atol=1e-5, rtol=1e-5)

    print("KERNEL_OK")
</pallas_src>

<mosaic_0001>
module attributes {stable_mosaic.version = 11 : i64} {
  func.func @fm_packed_kernel(%arg0: i32, %arg1: memref<24x128xf32, #tpu.memory_space<vmem>>, %arg2: memref<24x128xf32, #tpu.memory_space<vmem>>, %arg3: memref<128x128xf32, #tpu.memory_space<vmem>>, %arg4: memref<24x128xf32, #tpu.memory_space<vmem>>) attributes {dimension_semantics = [#tpu.dimension_semantics<parallel>], iteration_bounds = array<i64: 4>, scalar_prefetch = 0 : i64, scratch_operands = 0 : i64, tpu.core_type = #tpu.core_type<tc>, window_params = [{transform_indices = @transform_0, window_bounds = array<i64: 24, 128>}, {transform_indices = @transform_1, window_bounds = array<i64: 24, 128>}, {pipeline_mode = #tpu.pipeline_mode<synchronous>, transform_indices = @transform_2, window_bounds = array<i64: 128, 128>}, {transform_indices = @transform_3, window_bounds = array<i64: 24, 128>}]} {
    %c0 = arith.constant 0 : index
    %c0_0 = arith.constant 0 : index
    %0 = vector.load %arg2[%c0, %c0_0] : memref<24x128xf32, #tpu.memory_space<vmem>>, vector<24x128xf32>
    %c0_1 = arith.constant 0 : index
    %c0_2 = arith.constant 0 : index
    %1 = vector.load %arg3[%c0_1, %c0_2] : memref<128x128xf32, #tpu.memory_space<vmem>>, vector<128x128xf32>
    %cst = arith.constant dense<0.000000e+00> : vector<24x128xf32>
    %2 = tpu.matmul %0, %1, %cst {dimension_numbers = #tpu.dot_dimension_numbers<[1], [0], [0], [1], [0, 0, 1, 1], [], []>, precision = #tpu.contract_precision<fp32>} : vector<24x128xf32>, vector<128x128xf32>, vector<24x128xf32> -> vector<24x128xf32>
    %c0_3 = arith.constant 0 : index
    %c0_4 = arith.constant 0 : index
    %3 = vector.load %arg1[%c0_3, %c0_4] : memref<24x128xf32, #tpu.memory_space<vmem>>, vector<24x128xf32>
    %4 = arith.addf %3, %2 : vector<24x128xf32>
    %c0_5 = arith.constant 0 : index
    %c0_6 = arith.constant 0 : index
    %5 = vector.load %arg4[%c0_5, %c0_6] : memref<24x128xf32, #tpu.memory_space<vmem>>, vector<24x128xf32>
    tpu.vector_store %arg4[%c0_5, %c0_6], %4 {strides = array<i32>} : memref<24x128xf32, #tpu.memory_space<vmem>>, vector<24x128xf32>,
    return
  }
  func.func @transform_0(%arg0: i32) -> (i32, i32) {
    %c0_i32 = arith.constant 0 : i32
    %c0_i32_0 = arith.constant 0 : i32
    return %arg0, %c0_i32 : i32, i32
  }
  func.func @transform_1(%arg0: i32) -> (i32, i32) {
    %c0_i32 = arith.constant 0 : i32
    %c0_i32_0 = arith.constant 0 : i32
    return %arg0, %c0_i32 : i32, i32
  }
  func.func @transform_2(%arg0: i32) -> (i32, i32) {
    %c0_i32 = arith.constant 0 : i32
    %c0_i32_0 = arith.constant 0 : i32
    %c0_i32_1 = arith.constant 0 : i32
    return %c0_i32, %c0_i32_0 : i32, i32
  }
  func.func @transform_3(%arg0: i32) -> (i32, i32) {
    %c0_i32 = arith.constant 0 : i32
    %c0_i32_0 = arith.constant 0 : i32
    return %arg0, %c0_i32 : i32, i32
  }
}

module attributes {stable_mosaic.version = 11 : i64} {
  func.func @fm_packed_kernel(%arg0: i32, %arg1: memref<32x128xf32, #tpu.memory_space<vmem>>, %arg2: memref<32x128xf32, #tpu.memory_space<vmem>>, %arg3: memref<128x128xf32, #tpu.memory_space<vmem>>, %arg4: memref<32x128xf32, #tpu.memory_space<vmem>>) attributes {dimension_semantics = [#tpu.dimension_semantics<parallel>], iteration_bounds = array<i64: 4>, scalar_prefetch = 0 : i64, scratch_operands = 0 : i64, tpu.core_type = #tpu.core_type<tc>, window_params = [{transform_indices = @transform_0, window_bounds = array<i64: 32, 128>}, {transform_indices = @transform_1, window_bounds = array<i64: 32, 128>}, {pipeline_mode = #tpu.pipeline_mode<synchronous>, transform_indices = @transform_2, window_bounds = array<i64: 128, 128>}, {transform_indices = @transform_3, window_bounds = array<i64: 32, 128>}]} {
    %c0 = arith.constant 0 : index
    %c0_0 = arith.constant 0 : index
    %0 = vector.load %arg2[%c0, %c0_0] : memref<32x128xf32, #tpu.memory_space<vmem>>, vector<32x128xf32>
    %c0_1 = arith.constant 0 : index
    %c0_2 = arith.constant 0 : index
    %1 = vector.load %arg3[%c0_1, %c0_2] : memref<128x128xf32, #tpu.memory_space<vmem>>, vector<128x128xf32>
    %cst = arith.constant dense<0.000000e+00> : vector<32x128xf32>
    %2 = tpu.matmul %0, %1, %cst {dimension_numbers = #tpu.dot_dimension_numbers<[1], [0], [0], [1], [0, 0, 1, 1], [], []>, precision = #tpu.contract_precision<fp32>} : vector<32x128xf32>, vector<128x128xf32>, vector<32x128xf32> -> vector<32x128xf32>
    %c0_3 = arith.constant 0 : index
    %c0_4 = arith.constant 0 : index
    %3 = vector.load %arg1[%c0_3, %c0_4] : memref<32x128xf32, #tpu.memory_space<vmem>>, vector<32x128xf32>
    %4 = arith.addf %3, %2 : vector<32x128xf32>
    %c0_5 = arith.constant 0 : index
    %c0_6 = arith.constant 0 : index
    %5 = vector.load %arg4[%c0_5, %c0_6] : memref<32x128xf32, #tpu.memory_space<vmem>>, vector<32x128xf32>
    tpu.vector_store %arg4[%c0_5, %c0_6], %4 {strides = array<i32>} : memref<32x128xf32, #tpu.memory_space<vmem>>, vector<32x128xf32>,
    return
  }
  func.func @transform_0(%arg0: i32) -> (i32, i32) {
    %c0_i32 = arith.constant 0 : i32
    %c0_i32_0 = arith.constant 0 : i32
    return %arg0, %c0_i32 : i32, i32
  }
  func.func @transform_1(%arg0: i32) -> (i32, i32) {
    %c0_i32 = arith.constant 0 : i32
    %c0_i32_0 = arith.constant 0 : i32
    return %arg0, %c0_i32 : i32, i32
  }
  func.func @transform_2(%arg0: i32) -> (i32, i32) {
    %c0_i32 = arith.constant 0 : i32
    %c0_i32_0 = arith.constant 0 : i32
    %c0_i32_1 = arith.constant 0 : i32
    return %c0_i32, %c0_i32_0 : i32, i32
  }
  func.func @transform_3(%arg0: i32) -> (i32, i32) {
    %c0_i32 = arith.constant 0 : i32
    %c0_i32_0 = arith.constant 0 : i32
    return %arg0, %c0_i32 : i32, i32
  }
}

</mosaic_0001>

<bundles_post_ra>
// kernel: fm_forward.2
= control target key start
LH: loop header
LB: loop body
LE: loop exit
PB: predicated region body
PF: predicated region fallthrough
CT: control target
= control target key end

     0   :  { %s1463_s12 = smov 0   ;;  %s1922_s0 = inlined_call_operand.vmem [shape: f32[128,128], index: 0, kind: input, shape index: {}]   ;;  %s1923_s1 = inlined_call_operand.vmem [shape: f32[128,128], index: 1, kind: input, shape index: {}]   ;;  %s1924_s2 = inlined_call_operand.vmem [shape: f32[128,128], index: 2, kind: input, shape index: {}]   ;;  %s1925_s3 = inlined_call_operand.vmem [shape: f32[128,128], index: 3, kind: output, shape index: {}]  }
   0x1 LB: > { %s1066_s13 = sadd.s32 4294967295, %s1441_s12   ;;  %p1070_p0 = scmp.ge.s32.totalorder %s1441_s12, 1  ;;  %s1441_s12 = sphi %s1463_s12, %s13_s12  }
   0x2   : > { %p149_p1 = scmp.lt.s32.totalorder %s1441_s12, 5 }
   0x4   : > { %p150_p2 = pnand %p1070_p0, %p149_p1 }
   0x5   : > { %s1071_s20 = sshll.u32 (!%p150_p2), %s1066_s13, 2 }
   0x6   : > { %153 = sbr.rel (%p150_p2) target bundleno = 331 (0x14b), region = 32  ;;  %p179_p3 = scmp.lt.s32.totalorder (!%p150_p2), %s1071_s20, 15 }
   0xb   : > { %v215_v0 = vld [vmem:[%s1924_s2 + $0x78] sm:$0xff]  ;;  %v214_v1 = vld [vmem:[%s1924_s2 + $0x70] sm:$0xff]  ;;  %v213_v2 = vld [vmem:[%s1924_s2 + $0x68] sm:$0xff]  ;;  %s1931_s20 = smov (!%p179_p3, %s1071_s20), 15 }
   0xc   : > { %v1480_v3 = vand.u32 4294901760, %v215_v0  ;;  %v1482_v4 = vand.u32 4294901760, %v214_v1  ;;  %v1484_v5 = vand.u32 4294901760, %v213_v2  ;;  %v212_v6 = vld [vmem:[%s1924_s2 + $0x60] sm:$0xff]  ;;  %v211_v7 = vld [vmem:[%s1924_s2 + $0x58] sm:$0xff]  ;;  %v210_v8 = vld [vmem:[%s1924_s2 + $0x50] sm:$0xff] }
   0xd   : > { %v1495_v9 = vand.u32 4294901760, %v212_v6  ;;  %v1497_v10 = vand.u32 4294901760, %v211_v7  ;;  %v1499_v11 = vand.u32 4294901760, %v210_v8  ;;  %v209_v12 = vld [vmem:[%s1924_s2 + $0x48] sm:$0xff]  ;;  %v208_v13 = vld [vmem:[%s1924_s2 + $0x40] sm:$0xff]  ;;  %v207_v18 = vld [vmem:[%s1924_s2 + $0x38] sm:$0xff] }
   0xe   : > { %1199 = vmatprep.subr.mxu0 %v1480_v3  ;;  %v1509_v14 = vsub.f32 %v215_v0, %v1480_v3  ;;  %v1512_v15 = vsub.f32 %v214_v1, %v1482_v4  ;;  %v1514_v16 = vand.u32 4294901760, %v209_v12  ;;  %v1517_v17 = vsub.f32 %v213_v2, %v1484_v5  ;;  %v206_v25 = vld [vmem:[%s1924_s2 + $0x30] sm:$0xff]  ;;  %s1566_s8 = sshll.u32 %s1931_s20, 3  ;;  %v205_v35 = vld [vmem:[%s1924_s2 + $0x28] sm:$0xff]  ;;  %v204_v40 = vld [vmem:[%s1924_s2 + $0x20] sm:$0xff] }
   0xf   : > { %1200 = vmatpush3.msra.mxu0 %v1480_v3  ;;  %v1524_v19 = vsub.f32 %v212_v6, %v1495_v9  ;;  %v1527_v20 = vsub.f32 %v211_v7, %v1497_v10  ;;  %v1539_v24 = vand.u32 4294901760, %v208_v13  ;;  %v1548_v27 = vand.u32 4294901760, %v207_v18  ;;  %s1587_s16 = scalar_lea.vmem %s1923_s1, %s1566_s8  ;;  %v203_v48 = vld [vmem:[%s1924_s2 + $0x18] sm:$0xff]  ;;  %v202_v59 = vld [vmem:[%s1924_s2 + $0x10] sm:$0xff]  ;;  %v201_v2 = vld [vmem:[%s1924_s2 + $0x8] sm:$0xff]  ;;  %s182_s27 = scalar_lea.vmem %s1922_s0, %s1566_s8 }
  0x10   : > { %1201 = vmatprep.subr.mxu0 %v1482_v4  ;;  %v1531_v21 = vand.u32 4294901760, %v1509_v14  ;;  %v1534_v22 = vand.u32 4294901760, %v1512_v15  ;;  %v1537_v23 = vand.u32 4294901760, %v1517_v17  ;;  %v1554_v29 = vsub.f32 %v210_v8, %v1499_v11  ;;  %v196_v49 = vld [vmem:[%s1587_s16] sm:$0xff]  ;;  %v197_v54 = vld [vmem:[%s1587_s16 + $0x8] sm:$0xff]  ;;  %s194_s30 = scalar_lea.vmem %s1925_s3, %s1566_s8 }
  0x11   : > { %1202 = vmatpush3.msra.mxu0 %v1482_v4  ;;  %v1546_v26 = vand.u32 4294901760, %v1524_v19  ;;  %v1551_v28 = vand.u32 4294901760, %v1527_v20  ;;  %v1564_v33 = vsub.f32 %v209_v12, %v1514_v16  ;;  %v1569_v34 = vand.u32 4294901760, %v206_v25 }
  0x12   : > { %1203 = vmatprep.subr.mxu0 %v1484_v5  ;;  %v341_v30 = vsub.f32 %v1509_v14, %v1531_v21  ;;  %v348_v31 = vsub.f32 %v1512_v15, %v1534_v22  ;;  %v355_v32 = vsub.f32 %v1517_v17, %v1537_v23  ;;  %v1578_v39 = vand.u32 4294901760, %v1554_v29 }
  0x13   : > { %1204 = vmatpush3.msra.mxu0 %v1484_v5  ;;  %v362_v38 = vsub.f32 %v1524_v19, %v1546_v26  ;;  %v369_v41 = vsub.f32 %v1527_v20, %v1551_v28  ;;  %v1593_v42 = vand.u32 4294901760, %v1564_v33  ;;  %v1596_v43 = vsub.f32 %v208_v13, %v1539_v24 }
  0x14   : > { %1205 = vmatprep.subr.mxu0 %v1495_v9  ;;  %v342_v36 = vand.u32 4294901760, %v341_v30  ;;  %v349_v37 = vand.u32 4294901760, %v348_v31  ;;  %v356_v44 = vand.u32 4294901760, %v355_v32  ;;  %v1599_v45 = vand.u32 4294901760, %v205_v35 }
  0x15   : > { %1206 = vmatpush3.msra.mxu0 %v1495_v9  ;;  %v1602_v46 = vsub.f32 %v207_v18, %v1548_v27  ;;  %v1605_v47 = vand.u32 4294901760, %v204_v40  ;;  %v363_v50 = vand.u32 4294901760, %v362_v38  ;;  %v376_v51 = vsub.f32 %v1554_v29, %v1578_v39  ;;  %v200_v18 = vld [vmem:[%s1924_s2] sm:$0xff] }
  0x16   : > { %1207 = vmatprep.subr.mxu0 %v1497_v10  ;;  %1237 = vmatprep.subr.mxu1 %v342_v36  ;;  %v1615_v52 = vand.u32 4294901760, %v1596_v43  ;;  %v1618_v53 = vsub.f32 %v206_v25, %v1569_v34  ;;  %v370_v55 = vand.u32 4294901760, %v369_v41  ;;  %v383_v56 = vsub.f32 %v1564_v33, %v1593_v42 }
  0x17   : > { %1208 = vmatpush3.msra.mxu0 %v1497_v10  ;;  %1238 = vmatpush3.msra.mxu1 %v342_v36  ;;  %v1625_v57 = vand.u32 4294901760, %v203_v48  ;;  %v1628_v58 = vand.u32 4294901760, %v1602_v46  ;;  %v1634_v60 = vsub.f32 %v205_v35, %v1599_v45  ;;  %v1636_v61 = vand.u32 4294901760, %v196_v49 }
  0x18   : > { %1209 = vmatprep.subr.mxu0 %v1499_v11  ;;  %1239 = vmatprep.subr.mxu1 %v349_v37  ;;  %v1639_v62 = vand.u32 4294901760, %v197_v54  ;;  %v377_v63 = vand.u32 4294901760, %v376_v51  ;;  %v390_v0 = vsub.f32 %v1596_v43, %v1615_v52  ;;  %v1645_v1 = vand.u32 4294901760, %v1618_v53 }
  0x19   : > { %1210 = vmatpush3.msra.mxu0 %v1499_v11  ;;  %1240 = vmatpush3.msra.mxu1 %v349_v37  ;;  %v1651_v6 = vsub.f32 %v204_v40, %v1605_v47  ;;  %v384_v7 = vand.u32 4294901760, %v383_v56  ;;  %v1654_v8 = vand.u32 4294901760, %v202_v59  ;;  %v397_v12 = vsub.f32 %v1602_v46, %v1628_v58 }
  0x1a   : > { %1211 = vmatprep.subr.mxu0 %v1514_v16  ;;  %1241 = vmatprep.subr.mxu1 %v356_v44  ;;  %v1660_v13 = vand.u32 4294901760, %v1634_v60  ;;  %v1666_v25 = vsub.f32 %v196_v49, %v1636_v61  ;;  %v1669_v30 = vsub.f32 %v203_v48, %v1625_v57  ;;  %v1672_v31 = vand.u32 4294901760, %v201_v2 }
  0x1b   : > { %1212 = vmatpush3.msra.mxu0 %v1514_v16  ;;  %1242 = vmatpush3.msra.mxu1 %v356_v44  ;;  %v1675_v32 = vsub.f32 %v197_v54, %v1639_v62  ;;  %v391_v35 = vand.u32 4294901760, %v390_v0  ;;  %v404_v36 = vsub.f32 %v1618_v53, %v1645_v1  ;;  %v1681_v37 = vand.u32 4294901760, %v1651_v6 }
  0x1c   : > { %1213 = vmatprep.subr.mxu0 %v1539_v24  ;;  %1243 = vmatprep.subr.mxu1 %v363_v50  ;;  %v1684_v38 = vand.u32 4294901760, %v200_v18  ;;  %v1687_v40 = vsub.f32 %v202_v59, %v1654_v8  ;;  %v398_v41 = vand.u32 4294901760, %v397_v12  ;;  %v411_v44 = vsub.f32 %v1634_v60, %v1660_v13 }
  0x1d   : > { %1214 = vmatpush3.msra.mxu0 %v1539_v24  ;;  %1244 = vmatpush3.msra.mxu1 %v363_v50  ;;  %v1927_v48 = vand.u32 4294901760, %v1666_v25  ;;  %v1694_v49 = vand.u32 4294901760, %v1669_v30  ;;  %v1926_v50 = vand.u32 4294901760, %v1675_v32  ;;  %v1699_v51 = vsub.f32 %v201_v2, %v1672_v31 }
  0x1e   : > { %1215 = vmatprep.subr.mxu0 %v1548_v27  ;;  %1245 = vmatprep.subr.mxu1 %v370_v55  ;;  %v405_v54 = vand.u32 4294901760, %v404_v36  ;;  %v1706_v56 = vand.u32 4294901760, %v1687_v40  ;;  %v1709_v59 = vsub.f32 %v200_v18, %v1684_v38 }
  0x1f   : > { %1216 = vmatpush3.msra.mxu0 %v1548_v27  ;;  %1246 = vmatpush3.msra.mxu1 %v370_v55  ;;  %v418_v55 = vsub.f32 %v1651_v6, %v1681_v37  ;;  %v300_v0 = vsub.f32 %v1666_v25, %v1927_v48  ;;  %v425_v2 = vsub.f32 %v1669_v30, %v1694_v49  ;;  %v1722_v12 = vand.u32 4294901760, %v1699_v51 }
  0x20   : > { %1217 = vmatprep.subr.mxu0 %v1569_v34  ;;  %1247 = vmatprep.subr.mxu1 %v377_v63  ;;  %v1729_v36 = vand.u32 4294901760, %v1709_v59 }
  0x21   : > { %1218 = vmatpush3.msra.mxu0 %v1569_v34  ;;  %1248 = vmatpush3.msra.mxu1 %v377_v63  ;;  %v412_v63 = vand.u32 4294901760, %v411_v44  ;;  %v419_v18 = vand.u32 4294901760, %v418_v55  ;;  %v426_v44 = vand.u32 4294901760, %v425_v2  ;;  %v439_v55 = vsub.f32 %v1699_v51, %v1722_v12  ;;  %v198_v2 = vld [vmem:[%s1587_s16 + $0x10] sm:$0xff] }
  0x22   : > { %1219 = vmatprep.subr.mxu0 %v1599_v45  ;;  %1249 = vmatprep.subr.mxu1 %v384_v7  ;;  %v446_v48 = vsub.f32 %v1709_v59, %v1729_v36 }
  0x23   : > { %1220 = vmatpush3.msra.mxu0 %v1599_v45  ;;  %1250 = vmatpush3.msra.mxu1 %v384_v7  ;;  %v310_v7 = vsub.f32 %v1675_v32, %v1926_v50 }
  0x24   : > { %1221 = vmatprep.subr.mxu0 %v1605_v47  ;;  %1251 = vmatprep.subr.mxu1 %v391_v35 }
  0x25   : > { %1222 = vmatpush3.msra.mxu0 %v1605_v47  ;;  %1252 = vmatpush3.msra.mxu1 %v391_v35  ;;  %v432_v35 = vsub.f32 %v1687_v40, %v1706_v56  ;;  %v311_v50 = vand.u32 4294901760, %v310_v7 }
  0x26   : > { %1223 = vmatprep.subr.mxu0 %v1625_v57  ;;  %1253 = vmatprep.subr.mxu1 %v398_v41 }
  0x27   : > { %1224 = vmatpush3.msra.mxu0 %v1625_v57  ;;  %1254 = vmatpush3.msra.mxu1 %v398_v41  ;;  %v301_v41 = vand.u32 4294901760, %v300_v0  ;;  %v447_v0 = vand.u32 4294901760, %v446_v48 }
  0x28   : > { %1225 = vmatprep.subr.mxu0 %v1654_v8  ;;  %1255 = vmatprep.subr.mxu1 %v405_v54 }
  0x29   : > { %1226 = vmatpush3.msra.mxu0 %v1654_v8  ;;  %1256 = vmatpush3.msra.mxu1 %v405_v54  ;;  %v433_v54 = vand.u32 4294901760, %v432_v35 }
  0x2a   : > { %1227 = vmatprep.subr.mxu0 %v1672_v31  ;;  %1257 = vmatprep.subr.mxu1 %v412_v63 }
  0x2b   : > { %1228 = vmatpush3.msra.mxu0 %v1672_v31  ;;  %1258 = vmatpush3.msra.mxu1 %v412_v63  ;;  %v440_v63 = vand.u32 4294901760, %v439_v55 }
  0x2c   : > { %1229 = vmatprep.subr.mxu0 %v1684_v38  ;;  %1259 = vmatprep.subr.mxu1 %v419_v18 }
  0x2d   : > { %1230 = vmatpush3.msra.mxu0 %v1684_v38  ;;  %1260 = vmatpush3.msra.mxu1 %v419_v18 }
  0x2e   : > { %1231 = vmatprep.mubr.f32.mxu0 %v301_v41  ;;  %1261 = vmatprep.subr.mxu1 %v426_v44 }
  0x2f   : > { %1275 = vmatprep.subr.mxu0 %v1509_v14  ;;  %1232 = vmatmul.mubr.f32.vlgmr.msra.gmra.mxu0 %v311_v50  ;;  %v199_v50 = vld [vmem:[%s1587_s16 + $0x18] sm:$0xff] }
  0x30   : > { %1262 = vmatpush3.msra.mxu1 %v426_v44  ;;  %1276 = vmatpush3.msra.mxu0 %v1509_v14  ;;  %v1751_v14 = vand.u32 4294901760, %v198_v2 }
  0x31   : > { %1263 = vmatprep.subr.mxu1 %v433_v54  ;;  %1277 = vmatprep.subr.mxu0 %v1512_v15 }
  0x32   : > { %1264 = vmatpush3.msra.mxu1 %v433_v54  ;;  %1278 = vmatpush3.msra.mxu0 %v1512_v15  ;;  %v1755_v15 = vand.u32 4294901760, %v199_v50 }
  0x33   : > { %1265 = vmatprep.subr.mxu1 %v440_v63  ;;  %1279 = vmatprep.subr.mxu0 %v1517_v17 }
  0x34   : > { %1266 = vmatpush3.msra.mxu1 %v440_v63  ;;  %1280 = vmatpush3.msra.mxu0 %v1517_v17  ;;  %v1764_v17 = vsub.f32 %v198_v2, %v1751_v14  ;;  %v988_v63 = vld [vmem:[%s182_s27 + $0x10] sm:$0xff] }
  0x35   : > { %1267 = vmatprep.subr.mxu1 %v447_v0  ;;  %1281 = vmatprep.subr.mxu0 %v1524_v19 }
  0x36   : > { %1268 = vmatpush3.msra.mxu1 %v447_v0  ;;  %1269 = vmatprep.mubr.f32.mxu1 %v1636_v61 }
  0x37   : > { %1282 = vmatpush3.msra.mxu0 %v1524_v19  ;;  %1270 = vmatmul.mubr.f32.vlgmr.msra.gmra.mxu1 %v1639_v62  ;;  %v1769_v19 = vsub.f32 %v199_v50, %v1755_v15 }
  0x38   : > { %1283 = vmatprep.subr.mxu0 %v1527_v20  ;;  %1313 = vmatprep.subr.mxu1 %v1480_v3 }
  0x39   : > { %1284 = vmatpush3.msra.mxu0 %v1527_v20  ;;  %1314 = vmatpush3.msra.mxu1 %v1480_v3  ;;  %v319_v20 = vand.u32 4294901760, %v1764_v17 }
  0x3a   : > { %1285 = vmatprep.subr.mxu0 %v1554_v29  ;;  %1315 = vmatprep.subr.mxu1 %v1482_v4 }
  0x3b   : > { %1286 = vmatpush3.msra.mxu0 %v1554_v29  ;;  %1316 = vmatpush3.msra.mxu1 %v1482_v4  ;;  %v329_v29 = vand.u32 4294901760, %v1769_v19 }
  0x3c   : > { %1287 = vmatprep.subr.mxu0 %v1564_v33  ;;  %1317 = vmatprep.subr.mxu1 %v1484_v5 }
  0x3d   : > { %1288 = vmatpush3.msra.mxu0 %v1564_v33  ;;  %1318 = vmatpush3.msra.mxu1 %v1484_v5  ;;  %v320_v33 = vsub.f32 %v1764_v17, %v319_v20 }
  0x3e   : > { %1289 = vmatprep.subr.mxu0 %v1596_v43  ;;  %1319 = vmatprep.subr.mxu1 %v1495_v9 }
  0x3f   : > { %1290 = vmatpush3.msra.mxu0 %v1596_v43  ;;  %1320 = vmatpush3.msra.mxu1 %v1495_v9  ;;  %v330_v43 = vsub.f32 %v1769_v19, %v329_v29 }
  0x40   : > { %1291 = vmatprep.subr.mxu0 %v1602_v46  ;;  %1321 = vmatprep.subr.mxu1 %v1497_v10 }
  0x41   : > { %1292 = vmatpush3.msra.mxu0 %v1602_v46  ;;  %1322 = vmatpush3.msra.mxu1 %v1497_v10  ;;  %v321_v46 = vand.u32 4294901760, %v320_v33 }
  0x42   : > { %1293 = vmatprep.subr.mxu0 %v1618_v53  ;;  %1323 = vmatprep.subr.mxu1 %v1499_v11 }
  0x43   : > { %1294 = vmatpush3.msra.mxu0 %v1618_v53  ;;  %1324 = vmatpush3.msra.mxu1 %v1499_v11  ;;  %v331_v53 = vand.u32 4294901760, %v330_v43 }
  0x44   : > { %1295 = vmatprep.subr.mxu0 %v1634_v60  ;;  %1325 = vmatprep.subr.mxu1 %v1514_v16 }
  0x45   : > { %1296 = vmatpush3.msra.mxu0 %v1634_v60  ;;  %1326 = vmatpush3.msra.mxu1 %v1514_v16 }
  0x46   : > { %1297 = vmatprep.subr.mxu0 %v1651_v6  ;;  %1327 = vmatprep.subr.mxu1 %v1539_v24 }
  0x47   : > { %1298 = vmatpush3.msra.mxu0 %v1651_v6  ;;  %1328 = vmatpush3.msra.mxu1 %v1539_v24 }
  0x48   : > { %1299 = vmatprep.subr.mxu0 %v1669_v30  ;;  %1329 = vmatprep.subr.mxu1 %v1548_v27 }
  0x49   : > { %1300 = vmatpush3.msra.mxu0 %v1669_v30  ;;  %1330 = vmatpush3.msra.mxu1 %v1548_v27 }
  0x4a   : > { %1301 = vmatprep.subr.mxu0 %v1687_v40  ;;  %1331 = vmatprep.subr.mxu1 %v1569_v34 }
  0x4b   : > { %1234 = vmatprep.mubr.f32.mxu0 %v321_v46  ;;  %1302 = vmatpush3.msra.mxu0 %v1687_v40 }
  0x4c   : > { %1332 = vmatpush3.msra.mxu1 %v1569_v34  ;;  %1235 = vmatmul.mubr.f32.gmra.mxu0 %v331_v53 }
  0x4d   : > { %1303 = vmatprep.subr.mxu0 %v1699_v51  ;;  %1333 = vmatprep.subr.mxu1 %v1599_v45 }
  0x4e   : > { %1304 = vmatpush3.msra.mxu0 %v1699_v51  ;;  %1334 = vmatpush3.msra.mxu1 %v1599_v45 }
  0x4f   : > { %1305 = vmatprep.subr.mxu0 %v1709_v59  ;;  %1335 = vmatprep.subr.mxu1 %v1605_v47 }
  0x50   : > { %1306 = vmatpush3.msra.mxu0 %v1709_v59  ;;  %1307 = vmatprep.mubr.f32.mxu0 %v1666_v25 }
  0x51   : > { %1336 = vmatpush3.msra.mxu1 %v1605_v47  ;;  %1272 = vmatprep.mubr.f32.mxu1 %v1751_v14 }
  0x52   : > { %1308 = vmatmul.mubr.f32.vlgmr.msra.gmra.mxu0 %v1675_v32  ;;  %1337 = vmatprep.subr.mxu1 %v1625_v57 }
  0x53   : > { %1351 = vmatprep.subr.mxu0 %v1531_v21  ;;  %1273 = vmatmul.mubr.f32.gmra.mxu1 %v1755_v15 }
  0x54   : > { %1338 = vmatpush3.msra.mxu1 %v1625_v57  ;;  %1352 = vmatpush3.msra.mxu0 %v1531_v21  ;;  %v1928_v21 = vand.u32 4294901760, %v1666_v25 }
  0x55   : > { %1339 = vmatprep.subr.mxu1 %v1654_v8  ;;  %1353 = vmatprep.subr.mxu0 %v1534_v22 }
  0x56   : > { %1310 = vmatprep.mubr.f32.mxu0 %v1764_v17  ;;  %1340 = vmatpush3.msra.mxu1 %v1654_v8 }
  0x57   : > { %1354 = vmatpush3.msra.mxu0 %v1534_v22  ;;  %1341 = vmatprep.subr.mxu1 %v1672_v31  ;;  %v1929_v22 = vand.u32 4294901760, %v1675_v32  ;;  %v987_v32 = vld [vmem:[%s182_s27 + $0x8] sm:$0xff] }
  0x58   : > { %1311 = vmatmul.mubr.f32.gmra.mxu0 %v1769_v19  ;;  %1355 = vmatprep.subr.mxu0 %v1537_v23 }
  0x59   : > { %1342 = vmatpush3.msra.mxu1 %v1672_v31  ;;  %1356 = vmatpush3.msra.mxu0 %v1537_v23 }
  0x5a   : > { %1343 = vmatprep.subr.mxu1 %v1684_v38  ;;  %1357 = vmatprep.subr.mxu0 %v1546_v26 }
  0x5b   : > { %1344 = vmatpush3.msra.mxu1 %v1684_v38  ;;  %1345 = vmatprep.mubr.f32.mxu1 %v1928_v21 }
  0x5c   : > { %1358 = vmatpush3.msra.mxu0 %v1546_v26  ;;  %1346 = vmatmul.mubr.f32.vlgmr.msra.gmra.mxu1 %v1929_v22 }
  0x5d   : > { %1359 = vmatprep.subr.mxu0 %v1551_v28  ;;  %1389 = vmatprep.subr.mxu1 %v1480_v3 }
  0x5e   : > { %1360 = vmatpush3.msra.mxu0 %v1551_v28  ;;  %1390 = vmatpush3.msra.mxu1 %v1480_v3 }
  0x5f   : > { %1361 = vmatprep.subr.mxu0 %v1578_v39  ;;  %1391 = vmatprep.subr.mxu1 %v1482_v4 }
  0x60   : > { %1348 = vmatprep.mubr.f32.mxu1 %v319_v20  ;;  %1362 = vmatpush3.msra.mxu0 %v1578_v39 }
  0x61   : > { %1392 = vmatpush3.msra.mxu1 %v1482_v4  ;;  %1363 = vmatprep.subr.mxu0 %v1593_v42 }
  0x62   : > { %1349 = vmatmul.mubr.f32.gmra.mxu1 %v329_v29  ;;  %1393 = vmatprep.subr.mxu1 %v1484_v5 }
  0x63   : > { %1364 = vmatpush3.msra.mxu0 %v1593_v42  ;;  %1394 = vmatpush3.msra.mxu1 %v1484_v5 }
  0x64   : > { %1365 = vmatprep.subr.mxu0 %v1615_v52  ;;  %1395 = vmatprep.subr.mxu1 %v1495_v9 }
  0x65   : > { %1366 = vmatpush3.msra.mxu0 %v1615_v52  ;;  %1396 = vmatpush3.msra.mxu1 %v1495_v9 }
  0x66   : > { %1367 = vmatprep.subr.mxu0 %v1628_v58  ;;  %1397 = vmatprep.subr.mxu1 %v1497_v10 }
  0x67   : > { %1368 = vmatpush3.msra.mxu0 %v1628_v58  ;;  %1398 = vmatpush3.msra.mxu1 %v1497_v10 }
  0x68   : > { %1369 = vmatprep.subr.mxu0 %v1645_v1  ;;  %1399 = vmatprep.subr.mxu1 %v1499_v11 }
  0x69   : > { %1370 = vmatpush3.msra.mxu0 %v1645_v1  ;;  %1400 = vmatpush3.msra.mxu1 %v1499_v11 }
  0x6a   : > { %1371 = vmatprep.subr.mxu0 %v1660_v13  ;;  %1401 = vmatprep.subr.mxu1 %v1514_v16 }
  0x6b   : > { %1372 = vmatpush3.msra.mxu0 %v1660_v13  ;;  %1402 = vmatpush3.msra.mxu1 %v1514_v16 }
  0x6c   : > { %1373 = vmatprep.subr.mxu0 %v1681_v37  ;;  %1403 = vmatprep.subr.mxu1 %v1539_v24 }
  0x6d   : > { %1374 = vmatpush3.msra.mxu0 %v1681_v37  ;;  %1404 = vmatpush3.msra.mxu1 %v1539_v24 }
  0x6e   : > { %1375 = vmatprep.subr.mxu0 %v1694_v49  ;;  %1405 = vmatprep.subr.mxu1 %v1548_v27 }
  0x6f   : > { %1376 = vmatpush3.msra.mxu0 %v1694_v49  ;;  %1406 = vmatpush3.msra.mxu1 %v1548_v27 }
  0x70   : > { %1377 = vmatprep.subr.mxu0 %v1706_v56  ;;  %1407 = vmatprep.subr.mxu1 %v1569_v34 }
  0x71   : > { %1378 = vmatpush3.msra.mxu0 %v1706_v56  ;;  %1408 = vmatpush3.msra.mxu1 %v1569_v34  ;;  %v986_v56 = vld [vmem:[%s182_s27] sm:$0xff] }
  0x72   : > { %1379 = vmatprep.subr.mxu0 %v1722_v12  ;;  %1409 = vmatprep.subr.mxu1 %v1599_v45 }
  0x73   : > { %1380 = vmatpush3.msra.mxu0 %v1722_v12  ;;  %1410 = vmatpush3.msra.mxu1 %v1599_v45 }
  0x74   : > { %1381 = vmatprep.subr.mxu0 %v1729_v36  ;;  %1411 = vmatprep.subr.mxu1 %v1605_v47 }
  0x75   : > { %1382 = vmatpush3.msra.mxu0 %v1729_v36  ;;  %1383 = vmatprep.mubr.f32.mxu0 %v1636_v61  ;;  %v989_v36 = vld [vmem:[%s182_s27 + $0x18] sm:$0xff] }
  0x76   : > { %1412 = vmatpush3.msra.mxu1 %v1605_v47  ;;  %1384 = vmatmul.mubr.f32.vlgmr.msra.gmra.mxu0 %v1639_v62 }
  0x77   : > { %1413 = vmatprep.subr.mxu1 %v1625_v57  ;;  %1386 = vmatprep.mubr.f32.mxu0 %v1751_v14 }
  0x78   : > { %1414 = vmatpush3.msra.mxu1 %v1625_v57  ;;  %1421 = vmatprep.mubr.f32.mxu1 %v1636_v61 }
  0x79   : > { %1415 = vmatprep.subr.mxu1 %v1654_v8 }
  0x7a   : > { %1416 = vmatpush3.msra.mxu1 %v1654_v8  ;;  %1387 = vmatmul.mubr.f32.gmra.mxu0 %v1755_v15 }
  0x7b   : > { %1417 = vmatprep.subr.mxu1 %v1672_v31 }
  0x7c   : > { %1418 = vmatpush3.msra.mxu1 %v1672_v31 }
  0x7d   : > { %1419 = vmatprep.subr.mxu1 %v1684_v38 }
  0x7e   : > { %1420 = vmatpush3.msra.mxu1 %v1684_v38 }
  0x7f   : > { %1422 = vmatmul.mubr.f32.vlgmr.msra.gmra.mxu1 %v1639_v62 }
  0x80   : > { %1424 = vmatprep.mubr.f32.mxu1 %v1751_v14 }
  0x83   : > { %1425 = vmatmul.mubr.f32.gmra.mxu1 %v1755_v15 }
  0xef   : > { %v1233_v3 = vpop.f32.mrf.mxu0 }
  0xf1   : > { %v303_v4 = vpop.f32.mrf.mxu0 }
  0xf7   : > { %v1271_v10 = vpop.f32.mrf.mxu1 }
  0xf8   : > { %v491_v45 = vadd.f32 %v1271_v10, %v1233_v3 }
  0xf9   : > { %v484_v16 = vpop.f32.mrf.mxu1 }
  0xfa   : > { %v485_v57 = vadd.f32 %v484_v16, %v303_v4 }
 0x10c   : > { %v1236_v5 = vpop.f32.mrf.mxu0 }
 0x10e   : > { %v323_v9 = vpop.f32.mrf.mxu0 }
 0x112   : > { %v1309_v11 = vpop.f32.mrf.mxu0 }
 0x113   : > { %v1274_v23 = vpop.f32.mrf.mxu1  ;;  %v614_v58 = vadd.f32 %v1309_v11, %v491_v45 }
 0x114   : > { %v606_v24 = vpop.f32.mrf.mxu0  ;;  %v503_v60 = vadd.f32 %v1274_v23, %v1236_v5 }
 0x115   : > { %v496_v26 = vpop.f32.mrf.mxu1  ;;  %v607_v61 = vadd.f32 %v606_v24, %v485_v57 }
 0x116   : > { %v497_v62 = vadd.f32 %v496_v26, %v323_v9 }
 0x118   : > { %v1312_v27 = vpop.f32.mrf.mxu0 }
 0x119   : > { %v628_v13 = vadd.f32 %v1312_v27, %v503_v60 }
 0x11a   : > { %v620_v34 = vpop.f32.mrf.mxu0 }
 0x11b   : > { %v621_v37 = vadd.f32 %v620_v34, %v497_v62 }
 0x11c   : > { %v1347_v28 = vpop.f32.mrf.mxu1 }
 0x11d   : > { %v725_v1 = vadd.f32 %v1347_v28, %v614_v58 }
 0x11e   : > { %v716_v39 = vpop.f32.mrf.mxu1 }
 0x11f   : > { %v717_v25 = vadd.f32 %v716_v39, %v607_v61 }
 0x122   : > { %v1350_v47 = vpop.f32.mrf.mxu1 }
 0x123   : > { %v741_v38 = vadd.f32 %v1350_v47, %v628_v13 }
 0x124   : > { %v732_v6 = vpop.f32.mrf.mxu1 }
 0x125   : > { %v733_v59 = vadd.f32 %v732_v6, %v621_v37 }
 0x136   : > { %v1385_v42 = vpop.f32.mrf.mxu0 }
 0x137   : > { %v866_v30 = vadd.f32 %v1385_v42, %v725_v1 }
 0x138   : > { %v859_v52 = vpop.f32.mrf.mxu0 }
 0x139   : > { %v860_v40 = vadd.f32 %v859_v52, %v717_v25 }
 0x13a   : > { %v1388_v8 = vpop.f32.mrf.mxu0 }
 0x13b   : > { %v878_v7 = vadd.f32 %v1388_v8, %v741_v38 }
 0x13c   : > { %v871_v49 = vpop.f32.mrf.mxu0 }
 0x13d   : > { %v872_v41 = vadd.f32 %v871_v49, %v733_v59 }
 0x13f   : > { %v1423_v31 = vpop.f32.mrf.mxu1 }
 0x140   : > { %v971_v48 = vadd.f32 %v1423_v31, %v866_v30 }
 0x141   : > { %v964_v51 = vpop.f32.mrf.mxu1 }
 0x142   : > { %v991_v12 = vadd.f32 %v987_v32, %v971_v48  ;;  %v965_v18 = vadd.f32 %v964_v51, %v860_v40 }
 0x143   : > { %v1426_v35 = vpop.f32.mrf.mxu1 }
 0x144   : > { %995 = vst [vmem:[%s194_s30 + $0x8] sm:$0xff] %v991_v12  ;;  %v990_v44 = vadd.f32 %v986_v56, %v965_v18  ;;  %v983_v55 = vadd.f32 %v1426_v35, %v878_v7 }
 0x145   : > { %v976_v54 = vpop.f32.mrf.mxu1 }
 0x146   : > { %994 = vst [vmem:[%s194_s30] sm:$0xff] %v990_v44  ;;  %v993_v0 = vadd.f32 %v989_v36, %v983_v55  ;;  %v977_v2 = vadd.f32 %v976_v54, %v872_v41 }
 0x148   : > { %997 = vst [vmem:[%s194_s30 + $0x18] sm:$0xff] %v993_v0  ;;  %v992_v50 = vadd.f32 %v988_v63, %v977_v2 }
 0x14a   : > { %996 = vst [vmem:[%s194_s30 + $0x10] sm:$0xff] %v992_v50 }
 0x14b PF: > { %s13_s12 = sadd.s32 1, %s1441_s12  }
 0x14c   : > { %p10_p4 = scmp.ge.s32.totalorder %s13_s12, 6  }
 0x14e   :  { %12 = sbr.rel (!%p10_p4) target bundleno = 1 (0x1), region = 65 }

// kernel: fm_forward.3
= control target key start
LH: loop header
LB: loop body
LE: loop exit
PB: predicated region body
PF: predicated region fallthrough
CT: control target
= control target key end

     0   :  { %s1429_s12 = smov 0   ;;  %s1928_s0 = inlined_call_operand.vmem [shape: f32[96,128], index: 0, kind: input, shape index: {}]   ;;  %s1929_s1 = inlined_call_operand.vmem [shape: f32[96,128], index: 1, kind: input, shape index: {}]   ;;  %s1930_s2 = inlined_call_operand.vmem [shape: f32[128,128], index: 2, kind: input, shape index: {}]   ;;  %s1931_s3 = inlined_call_operand.vmem [shape: f32[96,128], index: 3, kind: output, shape index: {}]  }
   0x1 LB: > { %s1019_s13 = sadd.s32 4294967295, %s1405_s12   ;;  %p1023_p0 = scmp.ge.s32.totalorder %s1405_s12, 1  ;;  %s1405_s12 = sphi %s1429_s12, %s13_s12  }
   0x2   : > { %p149_p1 = scmp.lt.s32.totalorder %s1405_s12, 5 }
   0x4   : > { %p150_p2 = pnand %p1023_p0, %p149_p1 }
   0x5   : > { %s1446_s20 = smul.u32 (!%p150_p2), 3, %s1019_s13 }
   0x6   : > { %153 = sbr.rel (%p150_p2) target bundleno = 335 (0x14f), region = 32 }
   0x7   : > { %p179_p3 = scmp.lt.s32.totalorder (!%p150_p2), %s1446_s20, 11 }
   0xb   : > { %v214_v0 = vld [vmem:[%s1930_s2 + $0x78] sm:$0xff]  ;;  %v213_v1 = vld [vmem:[%s1930_s2 + $0x70] sm:$0xff]  ;;  %v212_v2 = vld [vmem:[%s1930_s2 + $0x68] sm:$0xff]  ;;  %v1407_v3 = vmov 0.0   ;;  %vm1408_vm0 = vmmov 0   ;;  %s1933_s20 = smov (!%p179_p3, %s1446_s20), 11 }
   0xc   : > { %1143 = vmatprep.subr.mxu0 %v1407_v3  ;;  %v1449_v4 = vand.u32 4294901760, %v214_v0  ;;  %v1451_v5 = vand.u32 4294901760, %v213_v1  ;;  %v1453_v6 = vand.u32 4294901760, %v212_v2  ;;  %v211_v7 = vld [vmem:[%s1930_s2 + $0x60] sm:$0xff]  ;;  %1184 = vmatprep.subr.mxu1 %v1407_v3  ;;  %v210_v8 = vld [vmem:[%s1930_s2 + $0x58] sm:$0xff]  ;;  %v209_v9 = vld [vmem:[%s1930_s2 + $0x50] sm:$0xff] }
   0xd   : > { %v1465_v10 = vand.u32 4294901760, %v211_v7  ;;  %v1467_v11 = vand.u32 4294901760, %v210_v8  ;;  %v1469_v12 = vand.u32 4294901760, %v209_v9  ;;  %v208_v13 = vld [vmem:[%s1930_s2 + $0x48] sm:$0xff]  ;;  %v207_v14 = vld [vmem:[%s1930_s2 + $0x40] sm:$0xff]  ;;  %1175 = vmatprep.mubr.msk.f32.mxu0 %vm1408_vm0, %v1407_v3  ;;  %1216 = vmatprep.mubr.msk.f32.mxu1 %vm1408_vm0, %v1407_v3  ;;  %v206_v19 = vld [vmem:[%s1930_s2 + $0x38] sm:$0xff] }
   0xe   : > { %1144 = vmatpush3.msra.mxu0 %v1449_v4  ;;  %v1483_v15 = vsub.f32 %v214_v0, %v1449_v4  ;;  %v1486_v16 = vsub.f32 %v213_v1, %v1451_v5  ;;  %v1488_v17 = vand.u32 4294901760, %v208_v13  ;;  %v1491_v18 = vsub.f32 %v212_v2, %v1453_v6  ;;  %v205_v26 = vld [vmem:[%s1930_s2 + $0x30] sm:$0xff]  ;;  %s1535_s8 = sshll.u32 %s1933_s20, 3  ;;  %v204_v36 = vld [vmem:[%s1930_s2 + $0x28] sm:$0xff]  ;;  %v203_v41 = vld [vmem:[%s1930_s2 + $0x20] sm:$0xff] }
   0xf   : > { %1145 = vmatprep.subr.mxu0 %v1407_v3  ;;  %v1499_v20 = vsub.f32 %v211_v7, %v1465_v10  ;;  %v1502_v21 = vsub.f32 %v210_v8, %v1467_v11  ;;  %v1508_v25 = vand.u32 4294901760, %v207_v14  ;;  %v1516_v28 = vand.u32 4294901760, %v206_v19  ;;  %s1555_s16 = scalar_lea.vmem %s1929_s1, %s1535_s8  ;;  %v202_v49 = vld [vmem:[%s1930_s2 + $0x18] sm:$0xff]  ;;  %v201_v54 = vld [vmem:[%s1930_s2 + $0x10] sm:$0xff]  ;;  %v200_v60 = vld [vmem:[%s1930_s2 + $0x8] sm:$0xff]  ;;  %s182_s27 = scalar_lea.vmem %s1928_s0, %s1535_s8 }
  0x10   : > { %1146 = vmatpush3.msra.mxu0 %v1451_v5  ;;  %v329_v22 = vand.u32 4294901760, %v1483_v15  ;;  %v336_v23 = vand.u32 4294901760, %v1486_v16  ;;  %v343_v24 = vand.u32 4294901760, %v1491_v18  ;;  %v1520_v30 = vsub.f32 %v209_v9, %v1469_v12  ;;  %v196_v50 = vld [vmem:[%s1555_s16] sm:$0xff]  ;;  %s194_s30 = scalar_lea.vmem %s1931_s3, %s1535_s8 }
  0x11   : > { %1147 = vmatprep.subr.mxu0 %v1407_v3  ;;  %v350_v27 = vand.u32 4294901760, %v1499_v20  ;;  %v357_v29 = vand.u32 4294901760, %v1502_v21  ;;  %v1533_v34 = vsub.f32 %v208_v13, %v1488_v17  ;;  %v1538_v35 = vand.u32 4294901760, %v205_v26  ;;  %v199_v7 = vld [vmem:[%s1930_s2] sm:$0xff] }
  0x12   : > { %1148 = vmatpush3.msra.mxu0 %v1453_v6  ;;  %v330_v31 = vsub.f32 %v1483_v15, %v329_v22  ;;  %v337_v32 = vsub.f32 %v1486_v16, %v336_v23  ;;  %v344_v33 = vsub.f32 %v1491_v18, %v343_v24  ;;  %v364_v40 = vand.u32 4294901760, %v1520_v30 }
  0x13   : > { %1149 = vmatprep.subr.mxu0 %v1407_v3  ;;  %v351_v39 = vsub.f32 %v1499_v20, %v350_v27  ;;  %v358_v42 = vsub.f32 %v1502_v21, %v357_v29  ;;  %v1562_v43 = vsub.f32 %v207_v14, %v1508_v25  ;;  %v1565_v45 = vand.u32 4294901760, %v204_v36 }
  0x14   : > { %1150 = vmatpush3.msra.mxu0 %v1465_v10  ;;  %v331_v37 = vand.u32 4294901760, %v330_v31  ;;  %v338_v38 = vand.u32 4294901760, %v337_v32  ;;  %v345_v44 = vand.u32 4294901760, %v344_v33  ;;  %v371_v46 = vand.u32 4294901760, %v1533_v34 }
  0x15   : > { %1151 = vmatprep.subr.mxu0 %v1407_v3  ;;  %v1569_v47 = vsub.f32 %v206_v19, %v1516_v28  ;;  %v1573_v48 = vand.u32 4294901760, %v203_v41  ;;  %v352_v51 = vand.u32 4294901760, %v351_v39  ;;  %v365_v52 = vsub.f32 %v1520_v30, %v364_v40 }
  0x16   : > { %1152 = vmatpush3.msra.mxu0 %v1467_v11  ;;  %1185 = vmatpush3.msra.mxu1 %v331_v37  ;;  %v378_v53 = vand.u32 4294901760, %v1562_v43  ;;  %v1588_v55 = vsub.f32 %v205_v26, %v1538_v35  ;;  %v359_v56 = vand.u32 4294901760, %v358_v42  ;;  %v372_v58 = vsub.f32 %v1533_v34, %v371_v46 }
  0x17   : > { %1153 = vmatprep.subr.mxu0 %v1407_v3  ;;  %1186 = vmatprep.subr.mxu1 %v1407_v3  ;;  %v385_v57 = vand.u32 4294901760, %v1569_v47  ;;  %v1597_v59 = vand.u32 4294901760, %v202_v49  ;;  %v1603_v61 = vsub.f32 %v204_v36, %v1565_v45  ;;  %v1605_v62 = vand.u32 4294901760, %v196_v50 }
  0x18   : > { %1154 = vmatpush3.msra.mxu0 %v1469_v12  ;;  %1187 = vmatpush3.msra.mxu1 %v338_v38  ;;  %v1609_v63 = vand.u32 4294901760, %v201_v54  ;;  %v366_v0 = vand.u32 4294901760, %v365_v52  ;;  %v379_v1 = vsub.f32 %v1562_v43, %v378_v53  ;;  %v392_v2 = vand.u32 4294901760, %v1588_v55 }
  0x19   : > { %1155 = vmatprep.subr.mxu0 %v1407_v3  ;;  %1188 = vmatprep.subr.mxu1 %v1407_v3  ;;  %v1620_v8 = vsub.f32 %v203_v41, %v1573_v48  ;;  %v386_v9 = vsub.f32 %v1569_v47, %v385_v57  ;;  %v1627_v13 = vand.u32 4294901760, %v200_v60  ;;  %v373_v14 = vand.u32 4294901760, %v372_v58 }
  0x1a   : > { %1156 = vmatpush3.msra.mxu0 %v1488_v17  ;;  %1189 = vmatpush3.msra.mxu1 %v345_v44  ;;  %v399_v19 = vand.u32 4294901760, %v1603_v61  ;;  %v1632_v26 = vsub.f32 %v196_v50, %v1605_v62  ;;  %v1635_v31 = vsub.f32 %v202_v49, %v1597_v59  ;;  %v1639_v32 = vand.u32 4294901760, %v199_v7 }
  0x1b   : > { %1157 = vmatprep.subr.mxu0 %v1407_v3  ;;  %1190 = vmatprep.subr.mxu1 %v1407_v3  ;;  %v380_v33 = vand.u32 4294901760, %v379_v1  ;;  %v393_v36 = vsub.f32 %v1588_v55, %v392_v2  ;;  %v406_v37 = vand.u32 4294901760, %v1620_v8  ;;  %v1647_v38 = vsub.f32 %v201_v54, %v1609_v63 }
  0x1c   : > { %1158 = vmatpush3.msra.mxu0 %v1508_v25  ;;  %1191 = vmatpush3.msra.mxu1 %v352_v51  ;;  %v387_v39 = vand.u32 4294901760, %v386_v9  ;;  %v400_v41 = vsub.f32 %v1603_v61, %v399_v19  ;;  %v298_v42 = vand.u32 4294901760, %v1632_v26  ;;  %v413_v44 = vand.u32 4294901760, %v1635_v31 }
  0x1d   : > { %1159 = vmatprep.subr.mxu0 %v1407_v3  ;;  %1192 = vmatprep.subr.mxu1 %v1407_v3  ;;  %v1658_v49 = vsub.f32 %v200_v60, %v1627_v13  ;;  %v394_v50 = vand.u32 4294901760, %v393_v36  ;;  %v407_v51 = vsub.f32 %v1620_v8, %v406_v37  ;;  %v420_v52 = vand.u32 4294901760, %v1647_v38 }
  0x1e   : > { %1160 = vmatpush3.msra.mxu0 %v1516_v28  ;;  %1193 = vmatpush3.msra.mxu1 %v359_v56  ;;  %v1668_v54 = vsub.f32 %v199_v7, %v1639_v32  ;;  %v401_v56 = vand.u32 4294901760, %v400_v41  ;;  %v299_v58 = vsub.f32 %v1632_v26, %v298_v42  ;;  %v414_v60 = vsub.f32 %v1635_v31, %v413_v44 }
  0x1f   : > { %1161 = vmatprep.subr.mxu0 %v1407_v3  ;;  %1194 = vmatprep.subr.mxu1 %v1407_v3  ;;  %v408_v1 = vand.u32 4294901760, %v407_v51  ;;  %v421_v7 = vsub.f32 %v1647_v38, %v420_v52  ;;  %v197_v51 = vld [vmem:[%s1555_s16 + $0x8] sm:$0xff] }
  0x20   : > { %1162 = vmatpush3.msra.mxu0 %v1538_v35  ;;  %1195 = vmatpush3.msra.mxu1 %v366_v0  ;;  %v427_v0 = vand.u32 4294901760, %v1658_v49  ;;  %v434_v9 = vand.u32 4294901760, %v1668_v54 }
  0x21   : > { %1163 = vmatprep.subr.mxu0 %v1407_v3  ;;  %1196 = vmatprep.subr.mxu1 %v1407_v3 }
  0x22   : > { %1164 = vmatpush3.msra.mxu0 %v1565_v45  ;;  %1197 = vmatpush3.msra.mxu1 %v373_v14  ;;  %v300_v14 = vand.u32 4294901760, %v299_v58  ;;  %v428_v36 = vsub.f32 %v1658_v49, %v427_v0  ;;  %v435_v41 = vsub.f32 %v1668_v54, %v434_v9  ;;  %v1708_v58 = vand.u32 4294901760, %v197_v51 }
  0x23   : > { %1165 = vmatprep.subr.mxu0 %v1407_v3  ;;  %1198 = vmatprep.subr.mxu1 %v1407_v3 }
  0x24   : > { %1166 = vmatpush3.msra.mxu0 %v1573_v48  ;;  %1199 = vmatpush3.msra.mxu1 %v380_v33  ;;  %v415_v33 = vand.u32 4294901760, %v414_v60  ;;  %v198_v60 = vld [vmem:[%s1555_s16 + $0x10] sm:$0xff] }
  0x25   : > { %1167 = vmatprep.subr.mxu0 %v1407_v3  ;;  %1200 = vmatprep.subr.mxu1 %v1407_v3 }
  0x26   : > { %1168 = vmatpush3.msra.mxu0 %v1597_v59  ;;  %1201 = vmatpush3.msra.mxu1 %v387_v39  ;;  %v422_v39 = vand.u32 4294901760, %v421_v7  ;;  %v1723_v7 = vand.u32 4294901760, %v198_v60 }
  0x27   : > { %1169 = vmatprep.subr.mxu0 %v1407_v3  ;;  %1202 = vmatprep.subr.mxu1 %v1407_v3 }
  0x28   : > { %1170 = vmatpush3.msra.mxu0 %v1609_v63  ;;  %1203 = vmatpush3.msra.mxu1 %v394_v50  ;;  %v429_v50 = vand.u32 4294901760, %v428_v36 }
  0x29   : > { %1171 = vmatprep.subr.mxu0 %v1407_v3  ;;  %1204 = vmatprep.subr.mxu1 %v1407_v3 }
  0x2a   : > { %1172 = vmatpush3.msra.mxu0 %v1627_v13  ;;  %1205 = vmatpush3.msra.mxu1 %v401_v56  ;;  %v436_v56 = vand.u32 4294901760, %v435_v41 }
  0x2b   : > { %1173 = vmatprep.subr.mxu0 %v1407_v3  ;;  %1206 = vmatprep.subr.mxu1 %v1407_v3 }
  0x2c   : > { %1174 = vmatpush3.msra.mxu0 %v1639_v32  ;;  %1207 = vmatpush3.msra.mxu1 %v408_v1  ;;  %v1719_v1 = vsub.f32 %v197_v51, %v1708_v58 }
  0x2d   : > { %1208 = vmatprep.subr.mxu1 %v1407_v3  ;;  %1225 = vmatprep.subr.mxu0 %v1407_v3 }
  0x2e   : > { %1176 = vmatmul.mubr.f32.vlgmr.msra.gmra.mxu0 %v300_v14  ;;  %1209 = vmatpush3.msra.mxu1 %v415_v33  ;;  %v308_v14 = vand.u32 4294901760, %v1719_v1  ;;  %v1735_v33 = vsub.f32 %v198_v60, %v1723_v7 }
  0x2f   : > { %1226 = vmatpush3.msra.mxu0 %v1483_v15  ;;  %1210 = vmatprep.subr.mxu1 %v1407_v3 }
  0x30   : > { %1227 = vmatprep.subr.mxu0 %v1407_v3  ;;  %1211 = vmatpush3.msra.mxu1 %v422_v39  ;;  %v309_v36 = vsub.f32 %v1719_v1, %v308_v14  ;;  %v318_v39 = vand.u32 4294901760, %v1735_v33 }
  0x31   : > { %1228 = vmatpush3.msra.mxu0 %v1486_v16  ;;  %1212 = vmatprep.subr.mxu1 %v1407_v3 }
  0x32   : > { %1229 = vmatprep.subr.mxu0 %v1407_v3  ;;  %1213 = vmatpush3.msra.mxu1 %v429_v50  ;;  %v310_v41 = vand.u32 4294901760, %v309_v36  ;;  %v319_v50 = vsub.f32 %v1735_v33, %v318_v39 }
  0x33   : > { %1230 = vmatpush3.msra.mxu0 %v1491_v18  ;;  %1214 = vmatprep.subr.mxu1 %v1407_v3 }
  0x34   : > { %1231 = vmatprep.subr.mxu0 %v1407_v3  ;;  %1215 = vmatpush3.msra.mxu1 %v436_v56  ;;  %v320_v51 = vand.u32 4294901760, %v319_v50 }
  0x35   : > { %1232 = vmatpush3.msra.mxu0 %v1499_v20  ;;  %1217 = vmatmul.mubr.f32.vlgmr.msra.gmra.mxu1 %v1605_v62 }
  0x36   : > { %1233 = vmatprep.subr.mxu0 %v1407_v3  ;;  %1266 = vmatprep.subr.mxu1 %v1407_v3 }
  0x37   : > { %1234 = vmatpush3.msra.mxu0 %v1502_v21  ;;  %1267 = vmatpush3.msra.mxu1 %v1449_v4 }
  0x38   : > { %1235 = vmatprep.subr.mxu0 %v1407_v3  ;;  %1268 = vmatprep.subr.mxu1 %v1407_v3 }
  0x39   : > { %1236 = vmatpush3.msra.mxu0 %v1520_v30  ;;  %1269 = vmatpush3.msra.mxu1 %v1451_v5 }
  0x3a   : > { %1237 = vmatprep.subr.mxu0 %v1407_v3  ;;  %1270 = vmatprep.subr.mxu1 %v1407_v3 }
  0x3b   : > { %1238 = vmatpush3.msra.mxu0 %v1533_v34  ;;  %1271 = vmatpush3.msra.mxu1 %v1453_v6 }
  0x3c   : > { %1239 = vmatprep.subr.mxu0 %v1407_v3  ;;  %1272 = vmatprep.subr.mxu1 %v1407_v3 }
  0x3d   : > { %1240 = vmatpush3.msra.mxu0 %v1562_v43  ;;  %1273 = vmatpush3.msra.mxu1 %v1465_v10 }
  0x3e   : > { %1241 = vmatprep.subr.mxu0 %v1407_v3  ;;  %1274 = vmatprep.subr.mxu1 %v1407_v3 }
  0x3f   : > { %1242 = vmatpush3.msra.mxu0 %v1569_v47  ;;  %1275 = vmatpush3.msra.mxu1 %v1467_v11 }
  0x40   : > { %1243 = vmatprep.subr.mxu0 %v1407_v3  ;;  %1276 = vmatprep.subr.mxu1 %v1407_v3 }
  0x41   : > { %1244 = vmatpush3.msra.mxu0 %v1588_v55  ;;  %1277 = vmatpush3.msra.mxu1 %v1469_v12 }
  0x42   : > { %1245 = vmatprep.subr.mxu0 %v1407_v3  ;;  %1278 = vmatprep.subr.mxu1 %v1407_v3 }
  0x43   : > { %1246 = vmatpush3.msra.mxu0 %v1603_v61  ;;  %1279 = vmatpush3.msra.mxu1 %v1488_v17 }
  0x44   : > { %1247 = vmatprep.subr.mxu0 %v1407_v3  ;;  %1280 = vmatprep.subr.mxu1 %v1407_v3 }
  0x45   : > { %1178 = vmatprep.mubr.msk.f32.mxu0 %vm1408_vm0, %v1407_v3  ;;  %1248 = vmatpush3.msra.mxu0 %v1620_v8 }
  0x46   : > { %1281 = vmatpush3.msra.mxu1 %v1508_v25  ;;  %1179 = vmatmul.mubr.f32.gmra.mxu0 %v310_v41 }
  0x47   : > { %1249 = vmatprep.subr.mxu0 %v1407_v3  ;;  %1282 = vmatprep.subr.mxu1 %v1407_v3 }
  0x48   : > { %1250 = vmatpush3.msra.mxu0 %v1635_v31  ;;  %1283 = vmatpush3.msra.mxu1 %v1516_v28 }
  0x49   : > { %1251 = vmatprep.subr.mxu0 %v1407_v3  ;;  %1284 = vmatprep.subr.mxu1 %v1407_v3 }
  0x4a   : > { %1181 = vmatprep.mubr.msk.f32.mxu0 %vm1408_vm0, %v1407_v3  ;;  %1252 = vmatpush3.msra.mxu0 %v1647_v38 }
  0x4b   : > { %1285 = vmatpush3.msra.mxu1 %v1538_v35  ;;  %1182 = vmatmul.mubr.f32.gmra.mxu0 %v320_v51 }
  0x4c   : > { %1253 = vmatprep.subr.mxu0 %v1407_v3  ;;  %1286 = vmatprep.subr.mxu1 %v1407_v3 }
  0x4d   : > { %1254 = vmatpush3.msra.mxu0 %v1658_v49  ;;  %1287 = vmatpush3.msra.mxu1 %v1565_v45 }
  0x4e   : > { %1219 = vmatprep.mubr.msk.f32.mxu1 %vm1408_vm0, %v1407_v3  ;;  %1255 = vmatprep.subr.mxu0 %v1407_v3 }
  0x4f   : > { %1288 = vmatprep.subr.mxu1 %v1407_v3  ;;  %1220 = vmatmul.mubr.f32.gmra.mxu1 %v1708_v58 }
  0x50   : > { %1256 = vmatpush3.msra.mxu0 %v1668_v54  ;;  %1257 = vmatprep.mubr.msk.f32.mxu0 %vm1408_vm0, %v1407_v3 }
  0x51   : > { %1289 = vmatpush3.msra.mxu1 %v1573_v48  ;;  %1258 = vmatmul.mubr.f32.vlgmr.msra.gmra.mxu0 %v1632_v26 }
  0x52   : > { %1290 = vmatprep.subr.mxu1 %v1407_v3  ;;  %1307 = vmatprep.subr.mxu0 %v1407_v3 }
  0x53   : > { %1291 = vmatpush3.msra.mxu1 %v1597_v59  ;;  %1308 = vmatpush3.msra.mxu0 %v329_v22 }
  0x54   : > { %1222 = vmatprep.mubr.msk.f32.mxu1 %vm1408_vm0, %v1407_v3  ;;  %1292 = vmatprep.subr.mxu1 %v1407_v3 }
  0x55   : > { %1309 = vmatprep.subr.mxu0 %v1407_v3  ;;  %1223 = vmatmul.mubr.f32.gmra.mxu1 %v1723_v7 }
  0x56   : > { %1260 = vmatprep.mubr.msk.f32.mxu0 %vm1408_vm0, %v1407_v3  ;;  %1293 = vmatpush3.msra.mxu1 %v1609_v63 }
  0x57   : > { %1310 = vmatpush3.msra.mxu0 %v336_v23  ;;  %1294 = vmatprep.subr.mxu1 %v1407_v3 }
  0x58   : > { %1261 = vmatmul.mubr.f32.gmra.mxu0 %v1719_v1  ;;  %1311 = vmatprep.subr.mxu0 %v1407_v3 }
  0x59   : > { %1295 = vmatpush3.msra.mxu1 %v1627_v13  ;;  %1312 = vmatpush3.msra.mxu0 %v343_v24 }
  0x5a   : > { %1296 = vmatprep.subr.mxu1 %v1407_v3  ;;  %1313 = vmatprep.subr.mxu0 %v1407_v3 }
  0x5b   : > { %1263 = vmatprep.mubr.msk.f32.mxu0 %vm1408_vm0, %v1407_v3  ;;  %1297 = vmatpush3.msra.mxu1 %v1639_v32 }
  0x5c   : > { %1298 = vmatprep.mubr.msk.f32.mxu1 %vm1408_vm0, %v1407_v3  ;;  %1314 = vmatpush3.msra.mxu0 %v350_v27 }
  0x5d   : > { %1264 = vmatmul.mubr.f32.gmra.mxu0 %v1735_v33  ;;  %1299 = vmatmul.mubr.f32.vlgmr.msra.gmra.mxu1 %v298_v42 }
  0x5e   : > { %1315 = vmatprep.subr.mxu0 %v1407_v3  ;;  %1348 = vmatprep.subr.mxu1 %v1407_v3 }
  0x5f   : > { %1316 = vmatpush3.msra.mxu0 %v357_v29  ;;  %1349 = vmatpush3.msra.mxu1 %v1449_v4 }
  0x60   : > { %1317 = vmatprep.subr.mxu0 %v1407_v3  ;;  %1350 = vmatprep.subr.mxu1 %v1407_v3 }
  0x61   : > { %1301 = vmatprep.mubr.msk.f32.mxu1 %vm1408_vm0, %v1407_v3  ;;  %1318 = vmatpush3.msra.mxu0 %v364_v40 }
  0x62   : > { %1351 = vmatpush3.msra.mxu1 %v1451_v5  ;;  %1319 = vmatprep.subr.mxu0 %v1407_v3 }
  0x63   : > { %1302 = vmatmul.mubr.f32.gmra.mxu1 %v308_v14  ;;  %1352 = vmatprep.subr.mxu1 %v1407_v3 }
  0x64   : > { %1320 = vmatpush3.msra.mxu0 %v371_v46  ;;  %1353 = vmatpush3.msra.mxu1 %v1453_v6 }
  0x65   : > { %1321 = vmatprep.subr.mxu0 %v1407_v3  ;;  %1354 = vmatprep.subr.mxu1 %v1407_v3 }
  0x66   : > { %1304 = vmatprep.mubr.msk.f32.mxu1 %vm1408_vm0, %v1407_v3  ;;  %1322 = vmatpush3.msra.mxu0 %v378_v53 }
  0x67   : > { %1355 = vmatpush3.msra.mxu1 %v1465_v10  ;;  %1323 = vmatprep.subr.mxu0 %v1407_v3 }
  0x68   : > { %1305 = vmatmul.mubr.f32.gmra.mxu1 %v318_v39  ;;  %1356 = vmatprep.subr.mxu1 %v1407_v3 }
  0x69   : > { %1324 = vmatpush3.msra.mxu0 %v385_v57  ;;  %1357 = vmatpush3.msra.mxu1 %v1467_v11 }
  0x6a   : > { %1325 = vmatprep.subr.mxu0 %v1407_v3  ;;  %1358 = vmatprep.subr.mxu1 %v1407_v3 }
  0x6b   : > { %1326 = vmatpush3.msra.mxu0 %v392_v2  ;;  %1359 = vmatpush3.msra.mxu1 %v1469_v12  ;;  %v942_v2 = vld [vmem:[%s182_s27] sm:$0xff] }
  0x6c   : > { %1327 = vmatprep.subr.mxu0 %v1407_v3  ;;  %1360 = vmatprep.subr.mxu1 %v1407_v3 }
  0x6d   : > { %1328 = vmatpush3.msra.mxu0 %v399_v19  ;;  %1361 = vmatpush3.msra.mxu1 %v1488_v17 }
  0x6e   : > { %1329 = vmatprep.subr.mxu0 %v1407_v3  ;;  %1362 = vmatprep.subr.mxu1 %v1407_v3 }
  0x6f   : > { %1330 = vmatpush3.msra.mxu0 %v406_v37  ;;  %1363 = vmatpush3.msra.mxu1 %v1508_v25 }
  0x70   : > { %1331 = vmatprep.subr.mxu0 %v1407_v3  ;;  %1364 = vmatprep.subr.mxu1 %v1407_v3 }
  0x71   : > { %1332 = vmatpush3.msra.mxu0 %v413_v44  ;;  %1365 = vmatpush3.msra.mxu1 %v1516_v28  ;;  %v943_v44 = vld [vmem:[%s182_s27 + $0x8] sm:$0xff] }
  0x72   : > { %1333 = vmatprep.subr.mxu0 %v1407_v3  ;;  %1366 = vmatprep.subr.mxu1 %v1407_v3 }
  0x73   : > { %1334 = vmatpush3.msra.mxu0 %v420_v52  ;;  %1367 = vmatpush3.msra.mxu1 %v1538_v35 }
  0x74   : > { %1335 = vmatprep.subr.mxu0 %v1407_v3  ;;  %1368 = vmatprep.subr.mxu1 %v1407_v3 }
  0x75   : > { %1336 = vmatpush3.msra.mxu0 %v427_v0  ;;  %1369 = vmatpush3.msra.mxu1 %v1565_v45 }
  0x76   : > { %1337 = vmatprep.subr.mxu0 %v1407_v3  ;;  %1370 = vmatprep.subr.mxu1 %v1407_v3 }
  0x77   : > { %1338 = vmatpush3.msra.mxu0 %v434_v9  ;;  %1339 = vmatprep.mubr.msk.f32.mxu0 %vm1408_vm0, %v1407_v3 }
  0x78   : > { %1371 = vmatpush3.msra.mxu1 %v1573_v48  ;;  %1340 = vmatmul.mubr.f32.vlgmr.msra.gmra.mxu0 %v1605_v62 }
  0x79   : > { %1372 = vmatprep.subr.mxu1 %v1407_v3  ;;  %1342 = vmatprep.mubr.msk.f32.mxu0 %vm1408_vm0, %v1407_v3 }
  0x7a   : > { %1373 = vmatpush3.msra.mxu1 %v1597_v59  ;;  %1380 = vmatprep.mubr.msk.f32.mxu1 %vm1408_vm0, %v1407_v3 }
  0x7b   : > { %1374 = vmatprep.subr.mxu1 %v1407_v3 }
  0x7c   : > { %1375 = vmatpush3.msra.mxu1 %v1609_v63  ;;  %1343 = vmatmul.mubr.f32.gmra.mxu0 %v1708_v58 }
  0x7d   : > { %1376 = vmatprep.subr.mxu1 %v1407_v3  ;;  %1345 = vmatprep.mubr.msk.f32.mxu0 %vm1408_vm0, %v1407_v3 }
  0x7e   : > { %1377 = vmatpush3.msra.mxu1 %v1627_v13 }
  0x7f   : > { %1378 = vmatprep.subr.mxu1 %v1407_v3 }
  0x80   : > { %1379 = vmatpush3.msra.mxu1 %v1639_v32  ;;  %1346 = vmatmul.mubr.f32.gmra.mxu0 %v1723_v7 }
  0x81   : > { %1381 = vmatmul.mubr.f32.vlgmr.msra.gmra.mxu1 %v1605_v62 }
  0x82   : > { %1383 = vmatprep.mubr.msk.f32.mxu1 %vm1408_vm0, %v1407_v3 }
  0x85   : > { %1384 = vmatmul.mubr.f32.gmra.mxu1 %v1708_v58  ;;  %v944_v58 = vld [vmem:[%s182_s27 + $0x10] sm:$0xff] }
  0x86   : > { %1386 = vmatprep.mubr.msk.f32.mxu1 %vm1408_vm0, %v1407_v3 }
  0x89   : > { %1387 = vmatmul.mubr.f32.gmra.mxu1 %v1723_v7 }
  0xee   : > { %v302_v4 = vpop.f32.mrf.mxu0 }
  0xf0   : > { %v1177_v5 = vpop.f32.mrf.mxu0 }
  0xf5   : > { %v473_v6 = vpop.f32.mrf.mxu1 }
  0xf6   : > { %v474_v10 = vadd.f32 %v473_v6, %v302_v4 }
  0xf7   : > { %v1218_v11 = vpop.f32.mrf.mxu1 }
 0x106   : > { %v312_v12 = vpop.f32.mrf.mxu0 }
 0x108   : > { %v1180_v15 = vpop.f32.mrf.mxu0 }
 0x10b   : > { %v322_v16 = vpop.f32.mrf.mxu0 }
 0x10d   : > { %v1183_v17 = vpop.f32.mrf.mxu0 }
 0x10f   : > { %v479_v18 = vpop.f32.mrf.mxu1 }
 0x110   : > { %v480_v53 = vadd.f32 %v479_v18, %v312_v12 }
 0x111   : > { %v589_v20 = vpop.f32.mrf.mxu0  ;;  %v1221_v21 = vpop.f32.mrf.mxu1 }
 0x112   : > { %v590_v47 = vadd.f32 %v589_v20, %v474_v10 }
 0x113   : > { %v1259_v22 = vpop.f32.mrf.mxu0 }
 0x115   : > { %v485_v23 = vpop.f32.mrf.mxu1 }
 0x116   : > { %v486_v8 = vadd.f32 %v485_v23, %v322_v16 }
 0x117   : > { %v1224_v24 = vpop.f32.mrf.mxu1 }
 0x118   : > { %v596_v25 = vpop.f32.mrf.mxu0 }
 0x119   : > { %v597_v59 = vadd.f32 %v596_v25, %v480_v53 }
 0x11a   : > { %v1262_v27 = vpop.f32.mrf.mxu0 }
 0x11d   : > { %v603_v3 = vpop.f32.mrf.mxu0  ;;  %v692_v28 = vpop.f32.mrf.mxu1 }
 0x11e   : > { %v693_v55 = vadd.f32 %v692_v28, %v590_v47  ;;  %v604_v32 = vadd.f32 %v603_v3, %v486_v8 }
 0x11f   : > { %v1300_v29 = vpop.f32.mrf.mxu1  ;;  %v1265_v30 = vpop.f32.mrf.mxu0 }
 0x123   : > { %v700_v34 = vpop.f32.mrf.mxu1 }
 0x124   : > { %v701_v13 = vadd.f32 %v700_v34, %v597_v59 }
 0x125   : > { %v1303_v35 = vpop.f32.mrf.mxu1 }
 0x128   : > { %v708_v40 = vpop.f32.mrf.mxu1 }
 0x129   : > { %v709_v49 = vadd.f32 %v708_v40, %v604_v32 }
 0x12a   : > { %v1306_v43 = vpop.f32.mrf.mxu1 }
 0x138   : > { %v827_v45 = vpop.f32.mrf.mxu0 }
 0x139   : > { %v828_v61 = vadd.f32 %v827_v45, %v693_v55 }
 0x13a   : > { %v1341_v46 = vpop.f32.mrf.mxu0 }
 0x13c   : > { %v833_v48 = vpop.f32.mrf.mxu0 }
 0x13d   : > { %v834_v37 = vadd.f32 %v833_v48, %v701_v13 }
 0x13e   : > { %v1344_v57 = vpop.f32.mrf.mxu0 }
 0x140   : > { %v839_v62 = vpop.f32.mrf.mxu0 }
 0x141   : > { %v926_v63 = vpop.f32.mrf.mxu1  ;;  %v840_v0 = vadd.f32 %v839_v62, %v709_v49 }
 0x142   : > { %v927_v19 = vadd.f32 %v926_v63, %v828_v61  ;;  %v1347_v26 = vpop.f32.mrf.mxu0 }
 0x143   : > { %v1382_v31 = vpop.f32.mrf.mxu1 }
 0x144   : > { %v945_v38 = vadd.f32 %v942_v2, %v927_v19 }
 0x145   : > { %v932_v42 = vpop.f32.mrf.mxu1 }
 0x146   : > { %948 = vst [vmem:[%s194_s30] sm:$0xff] %v945_v38  ;;  %v933_v52 = vadd.f32 %v932_v42, %v834_v37 }
 0x147   : > { %v1385_v54 = vpop.f32.mrf.mxu1 }
 0x148   : > { %v946_v9 = vadd.f32 %v943_v44, %v933_v52 }
 0x149   : > { %v938_v56 = vpop.f32.mrf.mxu1 }
 0x14a   : > { %949 = vst [vmem:[%s194_s30 + $0x8] sm:$0xff] %v946_v9  ;;  %v939_v60 = vadd.f32 %v938_v56, %v840_v0 }
 0x14b   : > { %v1388_v1 = vpop.f32.mrf.mxu1 }
 0x14c   : > { %v947_v7 = vadd.f32 %v944_v58, %v939_v60 }
 0x14e   : > { %950 = vst [vmem:[%s194_s30 + $0x10] sm:$0xff] %v947_v7 }
 0x14f PF: > { %s13_s12 = sadd.s32 1, %s1405_s12  }
 0x150   : > { %p10_p4 = scmp.ge.s32.totalorder %s13_s12, 6  }
 0x152   :  { %12 = sbr.rel (!%p10_p4) target bundleno = 1 (0x1), region = 65 }

</bundles_post_ra>
